<compile_context>
chip_gen: v5e
topology: v5e:2x2
jax: 0.10.0
libtpu: 0.0.40
codegen_flags: <defaults>
</compile_context>

<pallas_src>
import jax
import jax.numpy as jnp
from jax.experimental import pallas as pl
from jax.experimental.pallas import tpu as pltpu


def _oe_mlp_kernel(x_ref, w1_ref, b1_ref, w2_ref, b2_ref, o_ref):
    # Cast the x tile to the MXU operand dtype in VMEM (no-op if it already
    # matches; avoids an extra wrapper-side HBM pass over x).
    x = x_ref[...].astype(w1_ref.dtype)
    # Layer 1: packed x @ block-diag(W1); f32 accumulation on the MXU.
    h = jnp.dot(x, w1_ref[...], preferred_element_type=jnp.float32)
    # Bias add + ReLU stay f32 on the VPU (v5e-safe).
    h = jnp.maximum(h + b1_ref[...], 0.0)
    # Layer 2: h @ block-diag(W2) -> lane-dense (rows, 128) logits slab.
    out = jnp.dot(h.astype(w2_ref.dtype), w2_ref[...],
                  preferred_element_type=jnp.float32)
    o_ref[...] = (out + b2_ref[...]).astype(o_ref.dtype)


def _block_diag(w, k):
    """(a, b) -> (k*a, k*b) block-diagonal matrix with k copies of w."""
    a, b = w.shape
    eye = jnp.eye(k, dtype=w.dtype)
    return (eye[:, None, :, None] * w[None, :, None, :]).reshape(k * a, k * b)


def make_oe_mlp_forward(w1, b1, w2, b2, *,
                        compute_dtype=jnp.bfloat16,
                        out_dtype=jnp.float32,
                        tile_nodes=None):
    """Build a jitted OE/MLP forward: x [N, d] -> logits [N, c].

    Weight expansion (block-diag + tiled biases + casts) is done ONCE here and
    closed over, so per-call work is just pad/reshape + the Pallas kernel.
    """
    w1 = jnp.asarray(w1)
    w2 = jnp.asarray(w2)
    b1 = jnp.asarray(b1).reshape(1, -1).astype(jnp.float32)   # robust to 1-D bias
    b2 = jnp.asarray(b2).reshape(1, -1).astype(jnp.float32)

    d, hidden = w1.shape
    hidden2, c = w2.shape
    assert hidden2 == hidden, "W1/W2 shape mismatch"
    assert 128 % c == 0, "c must divide 128 for lane-dense packing"
    pack = 128 // c                      # nodes packed per 128-lane row
    assert (pack * d) % 128 == 0, "pack*d must be a multiple of 128"

    # --- Hoisted, call-invariant weight expansion (done once) ---------------
    w1_bd = _block_diag(w1.astype(compute_dtype), pack)   # (pack*d,      pack*hidden)
    w2_bd = _block_diag(w2.astype(compute_dtype), pack)   # (pack*hidden, pack*c=128)
    b1_t = jnp.tile(b1, (1, pack))                          # (1, pack*hidden) f32
    b2_t = jnp.tile(b2, (1, pack))                          # (1, 128)         f32
    w_bytes = int(w1_bd.nbytes + w2_bd.nbytes + b1_t.nbytes + b2_t.nbytes)

    gran = 8 * pack                      # 128-node padding granularity
    out_isz = jnp.dtype(out_dtype).itemsize

    def forward(x):
        n = x.shape[0]
        # Pad only to the 128-node packing granularity (NOT to the tile).
        n_pad = pl.cdiv(n, gran) * gran
        if n_pad != n:
            x = jnp.pad(x, ((0, n_pad - n), (0, 0)))
        rows_total = n_pad // pack                       # multiple of 8
        x_packed = x.reshape(rows_total, pack * d)       # free row-major reshape
        x_isz = jnp.dtype(x_packed.dtype).itemsize

        # --- Tile selection: big tiles, but grid >= 2 for v7x megacore ------
        if tile_nodes is None:
            target_rows = 2048                           # ~32K nodes per step
        else:
            target_rows = max(8, (tile_nodes // pack // 8) * 8)
        num_tiles = max(2, pl.cdiv(rows_total, target_rows))
        num_tiles = min(num_tiles, max(1, rows_total // 8))
        rows_per_tile = min(target_rows,
                            ((pl.cdiv(rows_total, num_tiles) + 7) // 8) * 8)
        grid = (pl.cdiv(rows_total, rows_per_tile),)     # last block may be partial

        # --- Explicit VMEM budget (safe on v7x's 64 MiB physical VMEM) ------
        in_tile_bytes = rows_per_tile * pack * d * x_isz
        out_tile_bytes = rows_per_tile * pack * c * out_isz
        vmem_need = 2 * (in_tile_bytes + out_tile_bytes) + w_bytes + (2 << 20)
        vmem_limit = int(min(max(vmem_need, 16 << 20), 32 << 20))

        # Advisory cost hint so XLA schedules the surrounding pad/reshape well.
        flops = 2 * rows_total * ((pack * d) * (pack * hidden)
                                  + (pack * hidden) * (pack * c))
        bytes_accessed = (rows_total * pack * d * x_isz
                          + rows_total * pack * c * out_isz + w_bytes)
        cost = pl.CostEstimate(flops=flops, transcendentals=0,
                               bytes_accessed=bytes_accessed)

        out_packed = pl.pallas_call(
            _oe_mlp_kernel,
            out_shape=jax.ShapeDtypeStruct((rows_total, pack * c), out_dtype),
            grid_spec=pl.GridSpec(
                grid=grid,
                in_specs=[
                    pl.BlockSpec((rows_per_tile, pack * d), lambda i: (i, 0)),   # x tile
                    pl.BlockSpec((pack * d, pack * hidden), lambda i: (0, 0)),   # W1 block-diag (invariant)
                    pl.BlockSpec((1, pack * hidden),        lambda i: (0, 0)),   # b1 tiled
                    pl.BlockSpec((pack * hidden, pack * c), lambda i: (0, 0)),   # W2 block-diag (invariant)
                    pl.BlockSpec((1, pack * c),             lambda i: (0, 0)),   # b2 tiled
                ],
                out_specs=pl.BlockSpec((rows_per_tile, pack * c), lambda i: (i, 0)),
            ),
            compiler_params=pltpu.CompilerParams(
                dimension_semantics=("parallel",),
                vmem_limit_bytes=vmem_limit,
            ),
            cost_estimate=cost,
        )(x_packed, w1_bd, b1_t, w2_bd, b2_t)

        return out_packed.reshape(n_pad, c)[:n]

    return jax.jit(forward)


def oe_forward_ref(x, w1, b1, w2, b2):
    h = jnp.maximum(x @ w1 + b1, 0.0)
    return h @ w2 + b2


if __name__ == "__main__":
    # Shapes consistent with the module: N nodes, d input features,
    # hidden_channels, c output classes, num_layers=2.  N is deliberately NOT
    # tile-aligned to exercise the 128-node padding path.
    N, d, hidden, c = 2000, 16, 32, 8

    key = jax.random.PRNGKey(0)
    kx, kw1, kb1, kw2, kb2 = jax.random.split(key, 5)

    x = jax.random.normal(kx, (N, d), dtype=jnp.float32)
    w1 = jax.random.normal(kw1, (d, hidden), dtype=jnp.float32) * 0.1
    b1 = jax.random.normal(kb1, (hidden,), dtype=jnp.float32) * 0.01   # 1-D bias (robustness)
    w2 = jax.random.normal(kw2, (hidden, c), dtype=jnp.float32) * 0.1
    b2 = jax.random.normal(kb2, (c,), dtype=jnp.float32) * 0.01

    ref = oe_forward_ref(x, w1, b1, w2, b2)

    # f32 MXU path: exact match vs reference.
    fwd_f32 = make_oe_mlp_forward(w1, b1, w2, b2, compute_dtype=jnp.float32)
    out_f32 = jax.block_until_ready(fwd_f32(x))
    assert out_f32.shape == (N, c)
    assert jnp.allclose(out_f32, ref, atol=1e-5, rtol=1e-5), "f32 mismatch vs reference"

    # Default path: bf16 MXU operands (all generations), f32 bias/ReLU/accum/output.
    fwd_bf16 = make_oe_mlp_forward(w1, b1, w2, b2)
    out_bf16 = jax.block_until_ready(fwd_bf16(x))
    assert out_bf16.shape == (N, c)
    assert jnp.allclose(out_bf16, ref, atol=5e-2, rtol=5e-2), "bf16 mismatch vs reference"

    # Ragged last tile: 768-node tiles over 2048 padded nodes -> grid=3 with a
    # partial (masked) final block; checks the non-divisible-grid path.
    fwd_rag = make_oe_mlp_forward(w1, b1, w2, b2, compute_dtype=jnp.float32,
                                  tile_nodes=768)
    out_rag = jax.block_until_ready(fwd_rag(x))
    assert jnp.allclose(out_rag, ref, atol=1e-5, rtol=1e-5), "ragged-tile mismatch"

    print("KERNEL_OK")
</pallas_src>

<mosaic_0001>
module attributes {stable_mosaic.version = 11 : i64} {
  func.func @_oe_mlp_kernel(%arg0: i32, %arg1: memref<64x256xf32, #tpu.memory_space<vmem>>, %arg2: memref<256x512xf32, #tpu.memory_space<vmem>>, %arg3: memref<1x512xf32, #tpu.memory_space<vmem>>, %arg4: memref<512x128xf32, #tpu.memory_space<vmem>>, %arg5: memref<1x128xf32, #tpu.memory_space<vmem>>, %arg6: memref<64x128xf32, #tpu.memory_space<vmem>>) attributes {dimension_semantics = [#tpu.dimension_semantics<parallel>], iteration_bounds = array<i64: 2>, scalar_prefetch = 0 : i64, scratch_operands = 0 : i64, tpu.core_type = #tpu.core_type<tc>, window_params = [{transform_indices = @transform_0, window_bounds = array<i64: 64, 256>}, {pipeline_mode = #tpu.pipeline_mode<synchronous>, transform_indices = @transform_1, window_bounds = array<i64: 256, 512>}, {pipeline_mode = #tpu.pipeline_mode<synchronous>, transform_indices = @transform_2, window_bounds = array<i64: 1, 512>}, {pipeline_mode = #tpu.pipeline_mode<synchronous>, transform_indices = @transform_3, window_bounds = array<i64: 512, 128>}, {pipeline_mode = #tpu.pipeline_mode<synchronous>, transform_indices = @transform_4, window_bounds = array<i64: 1, 128>}, {transform_indices = @transform_5, window_bounds = array<i64: 64, 128>}]} {
    %c0 = arith.constant 0 : index
    %c0_0 = arith.constant 0 : index
    %0 = vector.load %arg1[%c0, %c0_0] : memref<64x256xf32, #tpu.memory_space<vmem>>, vector<64x256xf32>
    %c0_1 = arith.constant 0 : index
    %c0_2 = arith.constant 0 : index
    %1 = vector.load %arg2[%c0_1, %c0_2] : memref<256x512xf32, #tpu.memory_space<vmem>>, vector<256x512xf32>
    %cst = arith.constant dense<0.000000e+00> : vector<64x512xf32>
    %2 = tpu.matmul %0, %1, %cst {dimension_numbers = #tpu.dot_dimension_numbers<[1], [0], [0], [1], [0, 0, 1, 1], [], []>} : vector<64x256xf32>, vector<256x512xf32>, vector<64x512xf32> -> vector<64x512xf32>
    %c0_3 = arith.constant 0 : index
    %c0_4 = arith.constant 0 : index
    %3 = vector.load %arg3[%c0_3, %c0_4] : memref<1x512xf32, #tpu.memory_space<vmem>>, vector<1x512xf32>
    %4 = vector.broadcast %3 : vector<1x512xf32> to vector<64x512xf32>
    %5 = arith.addf %2, %4 : vector<64x512xf32>
    %cst_5 = arith.constant 0.000000e+00 : f32
    %6 = vector.broadcast %cst_5 : f32 to vector<64x512xf32>
    %7 = arith.maximumf %5, %6 : vector<64x512xf32>
    %c0_6 = arith.constant 0 : index
    %c0_7 = arith.constant 0 : index
    %8 = vector.load %arg4[%c0_6, %c0_7] : memref<512x128xf32, #tpu.memory_space<vmem>>, vector<512x128xf32>
    %cst_8 = arith.constant dense<0.000000e+00> : vector<64x128xf32>
    %9 = tpu.matmul %7, %8, %cst_8 {dimension_numbers = #tpu.dot_dimension_numbers<[1], [0], [0], [1], [0, 0, 1, 1], [], []>} : vector<64x512xf32>, vector<512x128xf32>, vector<64x128xf32> -> vector<64x128xf32>
    %c0_9 = arith.constant 0 : index
    %c0_10 = arith.constant 0 : index
    %10 = vector.load %arg5[%c0_9, %c0_10] : memref<1x128xf32, #tpu.memory_space<vmem>>, vector<1x128xf32>
    %11 = vector.broadcast %10 : vector<1x128xf32> to vector<64x128xf32>
    %12 = arith.addf %9, %11 : vector<64x128xf32>
    %c0_11 = arith.constant 0 : index
    %c0_12 = arith.constant 0 : index
    %13 = vector.load %arg6[%c0_11, %c0_12] : memref<64x128xf32, #tpu.memory_space<vmem>>, vector<64x128xf32>
    tpu.vector_store %arg6[%c0_11, %c0_12], %12 {strides = array<i32>} : memref<64x128xf32, #tpu.memory_space<vmem>>, vector<64x128xf32>,
    return
  }
  func.func @transform_0(%arg0: i32) -> (i32, i32) {
    %c0_i32 = arith.constant 0 : i32
    %c0_i32_0 = arith.constant 0 : i32
    return %arg0, %c0_i32 : i32, i32
  }
  func.func @transform_1(%arg0: i32) -> (i32, i32) {
    %c0_i32 = arith.constant 0 : i32
    %c0_i32_0 = arith.constant 0 : i32
    %c0_i32_1 = arith.constant 0 : i32
    return %c0_i32, %c0_i32_0 : i32, i32
  }
  func.func @transform_2(%arg0: i32) -> (i32, i32) {
    %c0_i32 = arith.constant 0 : i32
    %c0_i32_0 = arith.constant 0 : i32
    %c0_i32_1 = arith.constant 0 : i32
    return %c0_i32, %c0_i32_0 : i32, i32
  }
  func.func @transform_3(%arg0: i32) -> (i32, i32) {
    %c0_i32 = arith.constant 0 : i32
    %c0_i32_0 = arith.constant 0 : i32
    %c0_i32_1 = arith.constant 0 : i32
    return %c0_i32, %c0_i32_0 : i32, i32
  }
  func.func @transform_4(%arg0: i32) -> (i32, i32) {
    %c0_i32 = arith.constant 0 : i32
    %c0_i32_0 = arith.constant 0 : i32
    %c0_i32_1 = arith.constant 0 : i32
    return %c0_i32, %c0_i32_0 : i32, i32
  }
  func.func @transform_5(%arg0: i32) -> (i32, i32) {
    %c0_i32 = arith.constant 0 : i32
    %c0_i32_0 = arith.constant 0 : i32
    return %arg0, %c0_i32 : i32, i32
  }
}

</mosaic_0001>

<bundles_post_ra>
// kernel: forward.1
= control target key start
LH: loop header
LB: loop body
LE: loop exit
PB: predicated region body
PF: predicated region fallthrough
CT: control target
= control target key end

     0   :  { %s1101_s18 = smov 0   ;;  %s1882_s0 = inlined_call_operand.vmem [shape: f32[128,256], index: 0, kind: input, shape index: {}]   ;;  %s1883_s1 = inlined_call_operand.vmem [shape: f32[256,512], index: 1, kind: input, shape index: {}]   ;;  %s1884_s2 = inlined_call_operand.vmem [shape: f32[1,512], index: 2, kind: input, shape index: {}]   ;;  %s1885_s3 = inlined_call_operand.vmem [shape: f32[512,128], index: 3, kind: input, shape index: {}]   ;;  %s1886_s4 = inlined_call_operand.vmem [shape: f32[1,128], index: 4, kind: input, shape index: {}]   ;;  %s1887_s5 = inlined_call_operand.vmem [shape: f32[128,128], index: 5, kind: output, shape index: {}]  }
   0x1 LB: > { %s1041_s19 = sadd.s32 4294967295, %s1069_s18   ;;  %p1045_p0 = scmp.ge.s32.totalorder %s1069_s18, 1  ;;  %s1069_s18 = sphi %s1101_s18, %s15_s18  }
   0x2   : > { %p189_p1 = scmp.lt.s32.totalorder %s1069_s18, 3 }
   0x4   : > { %p190_p2 = pnand %p1045_p0, %p189_p1 }
   0x5   : > { %s1201_s9 = sshll.u32 (!%p190_p2), %s1041_s19, 3 }
   0x6   : > { %193 = sbr.rel (%p190_p2) target bundleno = 438 (0x1b6), region = 40  ;;  %p219_p3 = scmp.lt.s32.totalorder (!%p190_p2), %s1201_s9, 15 }
   0xb   : > { %v307_v0 = vld [vmem:[%s1883_s1 + $0x1e0] sm:$0xff]  ;;  %v308_v1 = vld [vmem:[%s1883_s1 + $0x1e8] sm:$0xff]  ;;  %s1889_s9 = smov (!%p219_p3, %s1201_s9), 15  ;;  %v310_v63 = vld [vmem:[%s1883_s1 + $0x1f8] sm:$0xff] }
   0xc   : > { %v303_v2 = vld [vmem:[%s1883_s1 + $0x1c0] sm:$0xff]  ;;  %385 = vmatpush.msra.mxu0 %v307_v0  ;;  %467 = vmatpush.msra.mxu2 %v308_v1  ;;  %v304_v4 = vld [vmem:[%s1883_s1 + $0x1c8] sm:$0xff]  ;;  %s1053_s7 = sshll.u32 %s1889_s9, 4  ;;  %s1050_s27 = sshll.u32 %s1889_s9, 3 }
   0xd   : > { %v371_v3 = vld [vmem:[%s1883_s1 + $0x3e0] sm:$0xff]  ;;  %v372_v5 = vld [vmem:[%s1883_s1 + $0x3e8] sm:$0xff]  ;;  %s1297_s24 = scalar_lea.vmem %s1882_s0, %s1053_s7  ;;  %s1869_s30 = scalar_lea.vmem %s1887_s5, %s1050_s27 }
   0xe   : > { %426 = vmatpush.msra.mxu1 %v371_v3  ;;  %508 = vmatpush.msra.mxu3 %v372_v5  ;;  %v299_v6 = vld [vmem:[%s1883_s1 + $0x1a0] sm:$0xff]  ;;  %v300_v8 = vld [vmem:[%s1883_s1 + $0x1a8] sm:$0xff]  ;;  %v309_v3 = vld [vmem:[%s1883_s1 + $0x1f0] sm:$0xff] }
   0xf   : > { %v367_v7 = vld [vmem:[%s1883_s1 + $0x3c0] sm:$0xff]  ;;  %386 = vmatpush.msra.mxu0 %v303_v2  ;;  %468 = vmatpush.msra.mxu2 %v304_v4  ;;  %v368_v9 = vld [vmem:[%s1883_s1 + $0x3c8] sm:$0xff]  ;;  %v374_v4 = vld [vmem:[%s1883_s1 + $0x3f8] sm:$0xff] }
  0x10   : > { %v363_v10 = vld [vmem:[%s1883_s1 + $0x3a0] sm:$0xff]  ;;  %427 = vmatpush.msra.mxu1 %v367_v7  ;;  %509 = vmatpush.msra.mxu3 %v368_v9  ;;  %v296_v12 = vld [vmem:[%s1883_s1 + $0x188] sm:$0xff]  ;;  %v306_v5 = vld [vmem:[%s1883_s1 + $0x1d8] sm:$0xff] }
  0x11   : > { %v295_v11 = vld [vmem:[%s1883_s1 + $0x180] sm:$0xff]  ;;  %v364_v13 = vld [vmem:[%s1883_s1 + $0x3a8] sm:$0xff]  ;;  %387 = vmatpush.msra.mxu0 %v299_v6  ;;  %469 = vmatpush.msra.mxu2 %v300_v8  ;;  %v373_v6 = vld [vmem:[%s1883_s1 + $0x3f0] sm:$0xff] }
  0x12   : > { %v359_v14 = vld [vmem:[%s1883_s1 + $0x380] sm:$0xff]  ;;  %v360_v15 = vld [vmem:[%s1883_s1 + $0x388] sm:$0xff]  ;;  %428 = vmatpush.msra.mxu1 %v363_v10  ;;  %510 = vmatpush.msra.mxu3 %v364_v13  ;;  %v305_v7 = vld [vmem:[%s1883_s1 + $0x1d0] sm:$0xff] }
  0x13   : > { %v291_v16 = vld [vmem:[%s1883_s1 + $0x160] sm:$0xff]  ;;  %v292_v17 = vld [vmem:[%s1883_s1 + $0x168] sm:$0xff]  ;;  %388 = vmatpush.msra.mxu0 %v295_v11  ;;  %470 = vmatpush.msra.mxu2 %v296_v12  ;;  %v370_v8 = vld [vmem:[%s1883_s1 + $0x3d8] sm:$0xff] }
  0x14   : > { %v355_v18 = vld [vmem:[%s1883_s1 + $0x360] sm:$0xff]  ;;  %v356_v19 = vld [vmem:[%s1883_s1 + $0x368] sm:$0xff]  ;;  %429 = vmatpush.msra.mxu1 %v359_v14  ;;  %511 = vmatpush.msra.mxu3 %v360_v15  ;;  %v302_v9 = vld [vmem:[%s1883_s1 + $0x1b8] sm:$0xff] }
  0x15   : > { %v287_v20 = vld [vmem:[%s1883_s1 + $0x140] sm:$0xff]  ;;  %v288_v21 = vld [vmem:[%s1883_s1 + $0x148] sm:$0xff]  ;;  %389 = vmatpush.msra.mxu0 %v291_v16  ;;  %471 = vmatpush.msra.mxu2 %v292_v17  ;;  %v369_v10 = vld [vmem:[%s1883_s1 + $0x3d0] sm:$0xff] }
  0x16   : > { %v351_v22 = vld [vmem:[%s1883_s1 + $0x340] sm:$0xff]  ;;  %v352_v23 = vld [vmem:[%s1883_s1 + $0x348] sm:$0xff]  ;;  %430 = vmatpush.msra.mxu1 %v355_v18  ;;  %512 = vmatpush.msra.mxu3 %v356_v19  ;;  %v301_v11 = vld [vmem:[%s1883_s1 + $0x1b0] sm:$0xff] }
  0x17   : > { %v283_v24 = vld [vmem:[%s1883_s1 + $0x120] sm:$0xff]  ;;  %v284_v25 = vld [vmem:[%s1883_s1 + $0x128] sm:$0xff]  ;;  %390 = vmatpush.msra.mxu0 %v287_v20  ;;  %472 = vmatpush.msra.mxu2 %v288_v21  ;;  %v1358_v12 = vld [vmem:[%s1297_s24 + $0x10] sm:$0xff] }
  0x18   : > { %v347_v26 = vld [vmem:[%s1883_s1 + $0x320] sm:$0xff]  ;;  %v348_v27 = vld [vmem:[%s1883_s1 + $0x328] sm:$0xff]  ;;  %431 = vmatpush.msra.mxu1 %v351_v22  ;;  %513 = vmatpush.msra.mxu3 %v352_v23  ;;  %v366_v13 = vld [vmem:[%s1883_s1 + $0x3b8] sm:$0xff] }
  0x19   : > { %v279_v28 = vld [vmem:[%s1883_s1 + $0x100] sm:$0xff]  ;;  %v280_v29 = vld [vmem:[%s1883_s1 + $0x108] sm:$0xff]  ;;  %391 = vmatpush.msra.mxu0 %v283_v24  ;;  %473 = vmatpush.msra.mxu2 %v284_v25  ;;  %v298_v14 = vld [vmem:[%s1883_s1 + $0x198] sm:$0xff] }
  0x1a   : > { %v343_v30 = vld [vmem:[%s1883_s1 + $0x300] sm:$0xff]  ;;  %v344_v31 = vld [vmem:[%s1883_s1 + $0x308] sm:$0xff]  ;;  %432 = vmatpush.msra.mxu1 %v347_v26  ;;  %514 = vmatpush.msra.mxu3 %v348_v27  ;;  %v1367_v15 = vld [vmem:[%s1297_s24 + $0x18] sm:$0xff] }
  0x1b   : > { %v275_v32 = vld [vmem:[%s1883_s1 + $0xe0] sm:$0xff]  ;;  %v276_v33 = vld [vmem:[%s1883_s1 + $0xe8] sm:$0xff]  ;;  %392 = vmatpush.msra.mxu0 %v279_v28  ;;  %474 = vmatpush.msra.mxu2 %v280_v29  ;;  %v297_v16 = vld [vmem:[%s1883_s1 + $0x190] sm:$0xff] }
  0x1c   : > { %v339_v34 = vld [vmem:[%s1883_s1 + $0x2e0] sm:$0xff]  ;;  %v340_v35 = vld [vmem:[%s1883_s1 + $0x2e8] sm:$0xff]  ;;  %433 = vmatpush.msra.mxu1 %v343_v30  ;;  %515 = vmatpush.msra.mxu3 %v344_v31  ;;  %v365_v17 = vld [vmem:[%s1883_s1 + $0x3b0] sm:$0xff] }
  0x1d   : > { %v271_v36 = vld [vmem:[%s1883_s1 + $0xc0] sm:$0xff]  ;;  %v272_v37 = vld [vmem:[%s1883_s1 + $0xc8] sm:$0xff]  ;;  %393 = vmatpush.msra.mxu0 %v275_v32  ;;  %475 = vmatpush.msra.mxu2 %v276_v33  ;;  %v362_v18 = vld [vmem:[%s1883_s1 + $0x398] sm:$0xff] }
  0x1e   : > { %v335_v38 = vld [vmem:[%s1883_s1 + $0x2c0] sm:$0xff]  ;;  %v336_v39 = vld [vmem:[%s1883_s1 + $0x2c8] sm:$0xff]  ;;  %434 = vmatpush.msra.mxu1 %v339_v34  ;;  %516 = vmatpush.msra.mxu3 %v340_v35  ;;  %v294_v19 = vld [vmem:[%s1883_s1 + $0x178] sm:$0xff] }
  0x1f   : > { %v267_v40 = vld [vmem:[%s1883_s1 + $0xa0] sm:$0xff]  ;;  %v268_v41 = vld [vmem:[%s1883_s1 + $0xa8] sm:$0xff]  ;;  %394 = vmatpush.msra.mxu0 %v271_v36  ;;  %476 = vmatpush.msra.mxu2 %v272_v37  ;;  %v361_v20 = vld [vmem:[%s1883_s1 + $0x390] sm:$0xff] }
  0x20   : > { %v331_v42 = vld [vmem:[%s1883_s1 + $0x2a0] sm:$0xff]  ;;  %v332_v43 = vld [vmem:[%s1883_s1 + $0x2a8] sm:$0xff]  ;;  %435 = vmatpush.msra.mxu1 %v335_v38  ;;  %517 = vmatpush.msra.mxu3 %v336_v39  ;;  %v293_v21 = vld [vmem:[%s1883_s1 + $0x170] sm:$0xff] }
  0x21   : > { %v263_v44 = vld [vmem:[%s1883_s1 + $0x80] sm:$0xff]  ;;  %v264_v45 = vld [vmem:[%s1883_s1 + $0x88] sm:$0xff]  ;;  %395 = vmatpush.msra.mxu0 %v267_v40  ;;  %477 = vmatpush.msra.mxu2 %v268_v41  ;;  %v358_v22 = vld [vmem:[%s1883_s1 + $0x378] sm:$0xff] }
  0x22   : > { %v327_v46 = vld [vmem:[%s1883_s1 + $0x280] sm:$0xff]  ;;  %v328_v47 = vld [vmem:[%s1883_s1 + $0x288] sm:$0xff]  ;;  %436 = vmatpush.msra.mxu1 %v331_v42  ;;  %518 = vmatpush.msra.mxu3 %v332_v43  ;;  %v290_v23 = vld [vmem:[%s1883_s1 + $0x158] sm:$0xff] }
  0x23   : > { %v259_v48 = vld [vmem:[%s1883_s1 + $0x60] sm:$0xff]  ;;  %v260_v49 = vld [vmem:[%s1883_s1 + $0x68] sm:$0xff]  ;;  %396 = vmatpush.msra.mxu0 %v263_v44  ;;  %478 = vmatpush.msra.mxu2 %v264_v45  ;;  %v357_v24 = vld [vmem:[%s1883_s1 + $0x370] sm:$0xff] }
  0x24   : > { %v323_v50 = vld [vmem:[%s1883_s1 + $0x260] sm:$0xff]  ;;  %v324_v51 = vld [vmem:[%s1883_s1 + $0x268] sm:$0xff]  ;;  %437 = vmatpush.msra.mxu1 %v327_v46  ;;  %519 = vmatpush.msra.mxu3 %v328_v47  ;;  %v289_v25 = vld [vmem:[%s1883_s1 + $0x150] sm:$0xff] }
  0x25   : > { %v255_v52 = vld [vmem:[%s1883_s1 + $0x40] sm:$0xff]  ;;  %v256_v53 = vld [vmem:[%s1883_s1 + $0x48] sm:$0xff]  ;;  %397 = vmatpush.msra.mxu0 %v259_v48  ;;  %479 = vmatpush.msra.mxu2 %v260_v49  ;;  %v354_v27 = vld [vmem:[%s1883_s1 + $0x358] sm:$0xff] }
  0x26   : > { %v319_v54 = vld [vmem:[%s1883_s1 + $0x240] sm:$0xff]  ;;  %v320_v55 = vld [vmem:[%s1883_s1 + $0x248] sm:$0xff]  ;;  %438 = vmatpush.msra.mxu1 %v323_v50  ;;  %520 = vmatpush.msra.mxu3 %v324_v51  ;;  %v286_v28 = vld [vmem:[%s1883_s1 + $0x138] sm:$0xff] }
  0x27   : > { %v251_v56 = vld [vmem:[%s1883_s1 + $0x20] sm:$0xff]  ;;  %v252_v57 = vld [vmem:[%s1883_s1 + $0x28] sm:$0xff]  ;;  %398 = vmatpush.msra.mxu0 %v255_v52  ;;  %480 = vmatpush.msra.mxu2 %v256_v53  ;;  %v285_v30 = vld [vmem:[%s1883_s1 + $0x130] sm:$0xff] }
  0x28   : > { %v315_v58 = vld [vmem:[%s1883_s1 + $0x220] sm:$0xff]  ;;  %v316_v59 = vld [vmem:[%s1883_s1 + $0x228] sm:$0xff]  ;;  %439 = vmatpush.msra.mxu1 %v319_v54  ;;  %521 = vmatpush.msra.mxu3 %v320_v55  ;;  %v353_v31 = vld [vmem:[%s1883_s1 + $0x350] sm:$0xff] }
  0x29   : > { %v247_v60 = vld [vmem:[%s1883_s1] sm:$0xff]  ;;  %v248_v61 = vld [vmem:[%s1883_s1 + $0x8] sm:$0xff]  ;;  %399 = vmatpush.msra.mxu0 %v251_v56  ;;  %481 = vmatpush.msra.mxu2 %v252_v57  ;;  %v350_v32 = vld [vmem:[%s1883_s1 + $0x338] sm:$0xff] }
  0x2a   : > { %v1312_v62 = vld [vmem:[%s1297_s24] sm:$0xff]  ;;  %440 = vmatpush.msra.mxu1 %v315_v58  ;;  %522 = vmatpush.msra.mxu3 %v316_v59  ;;  %v312_v1 = vld [vmem:[%s1883_s1 + $0x208] sm:$0xff]  ;;  %v282_v33 = vld [vmem:[%s1883_s1 + $0x118] sm:$0xff] }
  0x2b   : > { %v311_v0 = vld [vmem:[%s1883_s1 + $0x200] sm:$0xff]  ;;  %400 = vmatpush.msra.mxu0 %v247_v60  ;;  %482 = vmatpush.msra.mxu2 %v248_v61  ;;  %v1324_v2 = vld [vmem:[%s1297_s24 + $0x8] sm:$0xff]  ;;  %v349_v34 = vld [vmem:[%s1883_s1 + $0x330] sm:$0xff] }
  0x2c   : > { %401 = vmatmul.f32.vlgmr.msra.gmra.mxu0 %v1312_v62  ;;  %483 = vmatmul.f32.vlgmr.msra.gmra.mxu2 %v1312_v62  ;;  %v1404_v26 = vld [vmem:[%s1297_s24 + $0x20] sm:$0xff]  ;;  %v1413_v29 = vld [vmem:[%s1297_s24 + $0x28] sm:$0xff]  ;;  %v281_v35 = vld [vmem:[%s1883_s1 + $0x110] sm:$0xff] }
  0x2d   : > { %631 = vmatpush.msrb.mxu2 %v310_v63  ;;  %441 = vmatpush.msra.mxu1 %v311_v0  ;;  %v346_v36 = vld [vmem:[%s1883_s1 + $0x318] sm:$0xff]  ;;  %v345_v38 = vld [vmem:[%s1883_s1 + $0x310] sm:$0xff]  ;;  %v1496_v54 = vld [vmem:[%s1297_s24 + $0x40] sm:$0xff] }
  0x2e   : > { %523 = vmatpush.msra.mxu3 %v312_v1  ;;  %442 = vmatmul.f32.vlgmr.msra.gmra.mxu1 %v1324_v2  ;;  %v278_v37 = vld [vmem:[%s1883_s1 + $0xf8] sm:$0xff]  ;;  %v277_v39 = vld [vmem:[%s1883_s1 + $0xf0] sm:$0xff]  ;;  %v1505_v57 = vld [vmem:[%s1297_s24 + $0x48] sm:$0xff] }
  0x2f   : > { %524 = vmatmul.f32.vlgmr.msra.gmra.mxu3 %v1324_v2  ;;  %549 = vmatpush.msrb.mxu0 %v309_v3  ;;  %v1450_v40 = vld [vmem:[%s1297_s24 + $0x30] sm:$0xff]  ;;  %v342_v41 = vld [vmem:[%s1883_s1 + $0x2f8] sm:$0xff] }
  0x30   : > { %672 = vmatpush.msrb.mxu3 %v374_v4  ;;  %632 = vmatpush.msrb.mxu2 %v306_v5  ;;  %v274_v42 = vld [vmem:[%s1883_s1 + $0xd8] sm:$0xff]  ;;  %v273_v44 = vld [vmem:[%s1883_s1 + $0xd0] sm:$0xff] }
  0x31   : > { %590 = vmatpush.msrb.mxu1 %v373_v6  ;;  %550 = vmatpush.msrb.mxu0 %v305_v7  ;;  %v1459_v43 = vld [vmem:[%s1297_s24 + $0x38] sm:$0xff]  ;;  %v341_v45 = vld [vmem:[%s1883_s1 + $0x2f0] sm:$0xff] }
  0x32   : > { %673 = vmatpush.msrb.mxu3 %v370_v8  ;;  %633 = vmatpush.msrb.mxu2 %v302_v9  ;;  %v338_v46 = vld [vmem:[%s1883_s1 + $0x2d8] sm:$0xff]  ;;  %v337_v48 = vld [vmem:[%s1883_s1 + $0x2d0] sm:$0xff] }
  0x33   : > { %591 = vmatpush.msrb.mxu1 %v369_v10  ;;  %551 = vmatpush.msrb.mxu0 %v301_v11  ;;  %v270_v47 = vld [vmem:[%s1883_s1 + $0xb8] sm:$0xff]  ;;  %v269_v49 = vld [vmem:[%s1883_s1 + $0xb0] sm:$0xff] }
  0x34   : > { %404 = vmatmul.f32.gmra.mxu0 %v1358_v12  ;;  %486 = vmatmul.f32.gmra.mxu2 %v1358_v12  ;;  %v334_v50 = vld [vmem:[%s1883_s1 + $0x2b8] sm:$0xff]  ;;  %v333_v52 = vld [vmem:[%s1883_s1 + $0x2b0] sm:$0xff] }
  0x35   : > { %674 = vmatpush.msrb.mxu3 %v366_v13  ;;  %634 = vmatpush.msrb.mxu2 %v298_v14  ;;  %v266_v51 = vld [vmem:[%s1883_s1 + $0x98] sm:$0xff]  ;;  %v265_v53 = vld [vmem:[%s1883_s1 + $0x90] sm:$0xff] }
  0x36   : > { %445 = vmatmul.f32.gmra.mxu1 %v1367_v15  ;;  %552 = vmatpush.msrb.mxu0 %v297_v16  ;;  %v330_v55 = vld [vmem:[%s1883_s1 + $0x298] sm:$0xff]  ;;  %v261_v58 = vld [vmem:[%s1883_s1 + $0x70] sm:$0xff]  ;;  %v1570_v16 = vld [vmem:[%s1297_s24 + $0x60] sm:$0xff] }
  0x37   : > { %527 = vmatmul.f32.gmra.mxu3 %v1367_v15  ;;  %592 = vmatpush.msrb.mxu1 %v365_v17  ;;  %v262_v56 = vld [vmem:[%s1883_s1 + $0x78] sm:$0xff]  ;;  %v329_v59 = vld [vmem:[%s1883_s1 + $0x290] sm:$0xff]  ;;  %v1573_v17 = vld [vmem:[%s1297_s24 + $0x68] sm:$0xff] }
  0x38   : > { %675 = vmatpush.msrb.mxu3 %v362_v18  ;;  %635 = vmatpush.msrb.mxu2 %v294_v19  ;;  %v326_v60 = vld [vmem:[%s1883_s1 + $0x278] sm:$0xff]  ;;  %v325_v63 = vld [vmem:[%s1883_s1 + $0x270] sm:$0xff] }
  0x39   : > { %593 = vmatpush.msrb.mxu1 %v361_v20  ;;  %553 = vmatpush.msrb.mxu0 %v293_v21  ;;  %v258_v61 = vld [vmem:[%s1883_s1 + $0x58] sm:$0xff]  ;;  %v257_v0 = vld [vmem:[%s1883_s1 + $0x50] sm:$0xff] }
  0x3a   : > { %676 = vmatpush.msrb.mxu3 %v358_v22  ;;  %636 = vmatpush.msrb.mxu2 %v290_v23  ;;  %v322_v1 = vld [vmem:[%s1883_s1 + $0x258] sm:$0xff]  ;;  %v321_v4 = vld [vmem:[%s1883_s1 + $0x250] sm:$0xff]  ;;  %v774_v22 = vld [vmem:[%s1885_s3 + $0xe8] sm:$0xff] }
  0x3b   : > { %594 = vmatpush.msrb.mxu1 %v357_v24  ;;  %554 = vmatpush.msrb.mxu0 %v289_v25  ;;  %v254_v3 = vld [vmem:[%s1883_s1 + $0x38] sm:$0xff]  ;;  %v253_v5 = vld [vmem:[%s1883_s1 + $0x30] sm:$0xff]  ;;  %v773_v24 = vld [vmem:[%s1885_s3 + $0xe0] sm:$0xff] }
  0x3c   : > { %407 = vmatmul.f32.gmra.mxu0 %v1404_v26  ;;  %489 = vmatmul.f32.gmra.mxu2 %v1404_v26  ;;  %v1542_v6 = vld [vmem:[%s1297_s24 + $0x50] sm:$0xff]  ;;  %v318_v7 = vld [vmem:[%s1883_s1 + $0x238] sm:$0xff] }
  0x3d   : > { %677 = vmatpush.msrb.mxu3 %v354_v27  ;;  %637 = vmatpush.msrb.mxu2 %v286_v28  ;;  %v250_v8 = vld [vmem:[%s1883_s1 + $0x18] sm:$0xff]  ;;  %v249_v10 = vld [vmem:[%s1883_s1 + $0x10] sm:$0xff]  ;;  %v754_v27 = vld [vmem:[%s1885_s3 + $0x48] sm:$0xff] }
  0x3e   : > { %448 = vmatmul.f32.gmra.mxu1 %v1413_v29  ;;  %555 = vmatpush.msrb.mxu0 %v285_v30  ;;  %v1551_v9 = vld [vmem:[%s1297_s24 + $0x58] sm:$0xff]  ;;  %v317_v11 = vld [vmem:[%s1883_s1 + $0x230] sm:$0xff]  ;;  %v770_v30 = vld [vmem:[%s1885_s3 + $0xc8] sm:$0xff] }
  0x3f   : > { %530 = vmatmul.f32.gmra.mxu3 %v1413_v29  ;;  %595 = vmatpush.msrb.mxu1 %v353_v31  ;;  %v314_v13 = vld [vmem:[%s1883_s1 + $0x218] sm:$0xff]  ;;  %v313_v14 = vld [vmem:[%s1883_s1 + $0x210] sm:$0xff] }
  0x40   : > { %678 = vmatpush.msrb.mxu3 %v350_v32  ;;  %638 = vmatpush.msrb.mxu2 %v282_v33  ;;  %v1580_v18 = vld [vmem:[%s1297_s24 + $0x70] sm:$0xff]  ;;  %v1583_v19 = vld [vmem:[%s1297_s24 + $0x78] sm:$0xff]  ;;  %v769_v32 = vld [vmem:[%s1885_s3 + $0xc0] sm:$0xff] }
  0x41   : > { %596 = vmatpush.msrb.mxu1 %v349_v34  ;;  %556 = vmatpush.msrb.mxu0 %v281_v35  ;;  %v760_v20 = vld [vmem:[%s1885_s3 + $0x78] sm:$0xff]  ;;  %v775_v21 = vld [vmem:[%s1885_s3 + $0xf0] sm:$0xff]  ;;  %v750_v35 = vld [vmem:[%s1885_s3 + $0x28] sm:$0xff] }
  0x42   : > { %679 = vmatpush.msrb.mxu3 %v346_v36  ;;  %639 = vmatpush.msrb.mxu2 %v278_v37  ;;  %v756_v23 = vld [vmem:[%s1885_s3 + $0x58] sm:$0xff]  ;;  %v755_v25 = vld [vmem:[%s1885_s3 + $0x50] sm:$0xff]  ;;  %v749_v37 = vld [vmem:[%s1885_s3 + $0x20] sm:$0xff] }
  0x43   : > { %597 = vmatpush.msrb.mxu1 %v345_v38  ;;  %557 = vmatpush.msrb.mxu0 %v277_v39  ;;  %v771_v28 = vld [vmem:[%s1885_s3 + $0xd0] sm:$0xff]  ;;  %v752_v31 = vld [vmem:[%s1885_s3 + $0x38] sm:$0xff]  ;;  %v766_v38 = vld [vmem:[%s1885_s3 + $0xa8] sm:$0xff] }
  0x44   : > { %410 = vmatmul.f32.gmra.mxu0 %v1450_v40  ;;  %492 = vmatmul.f32.gmra.mxu2 %v1450_v40  ;;  %v751_v33 = vld [vmem:[%s1885_s3 + $0x30] sm:$0xff]  ;;  %v768_v34 = vld [vmem:[%s1885_s3 + $0xb8] sm:$0xff] }
  0x45   : > { %680 = vmatpush.msrb.mxu3 %v342_v41  ;;  %640 = vmatpush.msrb.mxu2 %v274_v42  ;;  %v767_v36 = vld [vmem:[%s1885_s3 + $0xb0] sm:$0xff]  ;;  %v748_v39 = vld [vmem:[%s1885_s3 + $0x18] sm:$0xff] }
  0x46   : > { %451 = vmatmul.f32.gmra.mxu1 %v1459_v43  ;;  %558 = vmatpush.msrb.mxu0 %v273_v44  ;;  %v747_v41 = vld [vmem:[%s1885_s3 + $0x10] sm:$0xff]  ;;  %v764_v42 = vld [vmem:[%s1885_s3 + $0x98] sm:$0xff] }
  0x47   : > { %533 = vmatmul.f32.gmra.mxu3 %v1459_v43  ;;  %598 = vmatpush.msrb.mxu1 %v341_v45  ;;  %v763_v44 = vld [vmem:[%s1885_s3 + $0x90] sm:$0xff]  ;;  %v745_v45 = vld [vmem:[%s1885_s3] sm:$0xff] }
  0x48   : > { %681 = vmatpush.msrb.mxu3 %v338_v46  ;;  %641 = vmatpush.msrb.mxu2 %v270_v47  ;;  %v762_v46 = vld [vmem:[%s1885_s3 + $0x88] sm:$0xff]  ;;  %v792_v47 = vld [vmem:[%s1885_s3 + $0x178] sm:$0xff] }
  0x49   : > { %599 = vmatpush.msrb.mxu1 %v337_v48  ;;  %559 = vmatpush.msrb.mxu0 %v269_v49  ;;  %v808_v48 = vld [vmem:[%s1885_s3 + $0x1f8] sm:$0xff]  ;;  %v761_v49 = vld [vmem:[%s1885_s3 + $0x80] sm:$0xff] }
  0x4a   : > { %682 = vmatpush.msrb.mxu3 %v334_v50  ;;  %642 = vmatpush.msrb.mxu2 %v266_v51  ;;  %v791_v50 = vld [vmem:[%s1885_s3 + $0x170] sm:$0xff] }
  0x4b   : > { %600 = vmatpush.msrb.mxu1 %v333_v52  ;;  %560 = vmatpush.msrb.mxu0 %v265_v53  ;;  %v807_v51 = vld [vmem:[%s1885_s3 + $0x1f0] sm:$0xff]  ;;  %v790_v52 = vld [vmem:[%s1885_s3 + $0x168] sm:$0xff] }
  0x4c   : > { %413 = vmatmul.f32.gmra.mxu0 %v1496_v54  ;;  %495 = vmatmul.f32.gmra.mxu2 %v1496_v54  ;;  %v806_v53 = vld [vmem:[%s1885_s3 + $0x1e8] sm:$0xff] }
  0x4d   : > { %683 = vmatpush.msrb.mxu3 %v330_v55  ;;  %643 = vmatpush.msrb.mxu2 %v262_v56  ;;  %v1737_v55 = vld [vmem:[%s1884_s2] sm:$0xf] }
  0x4e   : > { %454 = vmatmul.f32.gmra.mxu1 %v1505_v57  ;;  %561 = vmatpush.msrb.mxu0 %v261_v58  ;;  %v805_v56 = vld [vmem:[%s1885_s3 + $0x1e0] sm:$0xff]  ;;  %v788_v58 = vld [vmem:[%s1885_s3 + $0x158] sm:$0xff] }
  0x4f   : > { %536 = vmatmul.f32.gmra.mxu3 %v1505_v57  ;;  %601 = vmatpush.msrb.mxu1 %v329_v59  ;;  %v804_v59 = vld [vmem:[%s1885_s3 + $0x1d8] sm:$0xff] }
  0x50   : > { %684 = vmatpush.msrb.mxu3 %v326_v60  ;;  %644 = vmatpush.msrb.mxu2 %v258_v61  ;;  %v787_v60 = vld [vmem:[%s1885_s3 + $0x150] sm:$0xff] }
  0x51   : > { %602 = vmatpush.msrb.mxu1 %v325_v63  ;;  %562 = vmatpush.msrb.mxu0 %v257_v0 }
  0x52   : > { %685 = vmatpush.msrb.mxu3 %v322_v1  ;;  %645 = vmatpush.msrb.mxu2 %v254_v3  ;;  %v1760_v3 = vperm.slane %v1737_v55, 1 }
  0x53   : > { %603 = vmatpush.msrb.mxu1 %v321_v4  ;;  %563 = vmatpush.msrb.mxu0 %v253_v5  ;;  %v803_v4 = vld [vmem:[%s1885_s3 + $0x1d0] sm:$0xff] }
  0x54   : > { %416 = vmatmul.f32.gmra.mxu0 %v1542_v6  ;;  %498 = vmatmul.f32.gmra.mxu2 %v1542_v6 }
  0x55   : > { %686 = vmatpush.msrb.mxu3 %v318_v7  ;;  %646 = vmatpush.msrb.mxu2 %v250_v8  ;;  %v802_v8 = vld [vmem:[%s1885_s3 + $0x1c8] sm:$0xff] }
  0x56   : > { %457 = vmatmul.f32.gmra.mxu1 %v1551_v9  ;;  %564 = vmatpush.msrb.mxu0 %v249_v10  ;;  %v785_v10 = vld [vmem:[%s1885_s3 + $0x140] sm:$0xff] }
  0x57   : > { %539 = vmatmul.f32.gmra.mxu3 %v1551_v9  ;;  %604 = vmatpush.msrb.mxu1 %v317_v11 }
  0x58   : > { %687 = vmatpush.msrb.mxu3 %v314_v13  ;;  %813 = vmatpush.msra.mxu0 %v760_v20  ;;  %v801_v20 = vld [vmem:[%s1885_s3 + $0x1c0] sm:$0xff] }
  0x59   : > { %605 = vmatpush.msrb.mxu1 %v313_v14  ;;  %895 = vmatpush.msra.mxu2 %v792_v47 }
  0x5a   : > { %936 = vmatpush.msra.mxu3 %v808_v48  ;;  %v796_v48 = vld [vmem:[%s1885_s3 + $0x198] sm:$0xff] }
  0x5b   : > { %896 = vmatpush.msra.mxu2 %v791_v50  ;;  %v779_v50 = vld [vmem:[%s1885_s3 + $0x110] sm:$0xff] }
  0x5c   : > { %419 = vmatmul.f32.gmra.mxu0 %v1570_v16  ;;  %501 = vmatmul.f32.gmra.mxu2 %v1570_v16 }
  0x5d   : > { %937 = vmatpush.msra.mxu3 %v807_v51  ;;  %897 = vmatpush.msra.mxu2 %v790_v52 }
  0x5e   : > { %460 = vmatmul.f32.gmra.mxu1 %v1573_v17 }
  0x5f   : > { %542 = vmatmul.f32.gmra.mxu3 %v1573_v17 }
  0x60   : > { %938 = vmatpush.msra.mxu3 %v806_v53 }
  0x62   : > { %939 = vmatpush.msra.mxu3 %v805_v56 }
  0x64   : > { %422 = vmatmul.f32.gmra.mxu0 %v1580_v18  ;;  %504 = vmatmul.f32.gmra.mxu2 %v1580_v18 }
  0x65   : > { %940 = vmatpush.msra.mxu3 %v804_v59 }
  0x66   : > { %463 = vmatmul.f32.gmra.mxu1 %v1583_v19 }
  0x67   : > { %545 = vmatmul.f32.gmra.mxu3 %v1583_v19 }
  0x68   : > { %941 = vmatpush.msra.mxu3 %v803_v4  ;;  %v777_v4 = vld [vmem:[%s1885_s3 + $0x100] sm:$0xff] }
  0x6a   : > { %942 = vmatpush.msra.mxu3 %v802_v8 }
  0x6c   : > { %565 = vmatmul.f32.vlgmr.msrb.gmra.mxu0 %v1312_v62  ;;  %647 = vmatmul.f32.vlgmr.msrb.gmra.mxu2 %v1312_v62  ;;  %v759_v62 = vld [vmem:[%s1885_s3 + $0x70] sm:$0xff] }
  0x6d   : > { %814 = vmatpush.msra.mxu0 %v759_v62  ;;  %943 = vmatpush.msra.mxu3 %v801_v20 }
  0x6e   : > { %606 = vmatmul.f32.vlgmr.msrb.gmra.mxu1 %v1324_v2 }
  0x6f   : > { %688 = vmatmul.f32.vlgmr.msrb.gmra.mxu3 %v1324_v2  ;;  %v776_v2 = vld [vmem:[%s1885_s3 + $0xf8] sm:$0xff] }
  0x70   : > { %854 = vmatpush.msra.mxu1 %v776_v2  ;;  %v784_v2 = vld [vmem:[%s1885_s3 + $0x138] sm:$0xff] }
  0x72   : > { %855 = vmatpush.msra.mxu1 %v775_v21  ;;  %v800_v21 = vld [vmem:[%s1885_s3 + $0x1b8] sm:$0xff] }
  0x73   : > { %944 = vmatpush.msra.mxu3 %v800_v21 }
  0x74   : > { %568 = vmatmul.f32.gmra.mxu0 %v1358_v12  ;;  %650 = vmatmul.f32.gmra.mxu2 %v1358_v12  ;;  %v758_v12 = vld [vmem:[%s1885_s3 + $0x68] sm:$0xff] }
  0x75   : > { %815 = vmatpush.msra.mxu0 %v758_v12  ;;  %856 = vmatpush.msra.mxu1 %v774_v22  ;;  %v783_v22 = vld [vmem:[%s1885_s3 + $0x130] sm:$0xff] }
  0x76   : > { %609 = vmatmul.f32.gmra.mxu1 %v1367_v15 }
  0x77   : > { %691 = vmatmul.f32.gmra.mxu3 %v1367_v15  ;;  %v757_v15 = vld [vmem:[%s1885_s3 + $0x60] sm:$0xff]  ;;  %857 = vmatpush.msra.mxu1 %v773_v24 }
  0x78   : > { %816 = vmatpush.msra.mxu0 %v757_v15 }
  0x7a   : > { %817 = vmatpush.msra.mxu0 %v756_v23 }
  0x7c   : > { %571 = vmatmul.f32.gmra.mxu0 %v1404_v26  ;;  %653 = vmatmul.f32.gmra.mxu2 %v1404_v26  ;;  %v772_v26 = vld [vmem:[%s1885_s3 + $0xd8] sm:$0xff] }
  0x7d   : > { %818 = vmatpush.msra.mxu0 %v755_v25  ;;  %858 = vmatpush.msra.mxu1 %v772_v26 }
  0x7e   : > { %612 = vmatmul.f32.gmra.mxu1 %v1413_v29 }
  0x7f   : > { %694 = vmatmul.f32.gmra.mxu3 %v1413_v29  ;;  %v753_v29 = vld [vmem:[%s1885_s3 + $0x40] sm:$0xff]  ;;  %819 = vmatpush.msra.mxu0 %v754_v27 }
  0x80   : > { %859 = vmatpush.msra.mxu1 %v771_v28 }
  0x81   : > { %820 = vmatpush.msra.mxu0 %v753_v29 }
  0x82   : > { %860 = vmatpush.msra.mxu1 %v770_v30  ;;  %v799_v30 = vld [vmem:[%s1885_s3 + $0x1b0] sm:$0xff] }
  0x83   : > { %821 = vmatpush.msra.mxu0 %v752_v31  ;;  %945 = vmatpush.msra.mxu3 %v799_v30 }
  0x84   : > { %574 = vmatmul.f32.gmra.mxu0 %v1450_v40  ;;  %656 = vmatmul.f32.gmra.mxu2 %v1450_v40  ;;  %v765_v40 = vld [vmem:[%s1885_s3 + $0xa0] sm:$0xff] }
  0x85   : > { %861 = vmatpush.msra.mxu1 %v769_v32  ;;  %822 = vmatpush.msra.mxu0 %v751_v33  ;;  %v782_v32 = vld [vmem:[%s1885_s3 + $0x128] sm:$0xff] }
  0x86   : > { %615 = vmatmul.f32.gmra.mxu1 %v1459_v43 }
  0x87   : > { %697 = vmatmul.f32.gmra.mxu3 %v1459_v43  ;;  %862 = vmatpush.msra.mxu1 %v768_v34  ;;  %v746_v43 = vld [vmem:[%s1885_s3 + $0x8] sm:$0xff] }
  0x88   : > { %823 = vmatpush.msra.mxu0 %v750_v35  ;;  %v798_v34 = vld [vmem:[%s1885_s3 + $0x1a8] sm:$0xff] }
  0x89   : > { %863 = vmatpush.msra.mxu1 %v767_v36  ;;  %946 = vmatpush.msra.mxu3 %v798_v34  ;;  %v781_v36 = vld [vmem:[%s1885_s3 + $0x120] sm:$0xff] }
  0x8a   : > { %824 = vmatpush.msra.mxu0 %v749_v37 }
  0x8b   : > { %864 = vmatpush.msra.mxu1 %v766_v38 }
  0x8c   : > { %577 = vmatmul.f32.gmra.mxu0 %v1496_v54  ;;  %659 = vmatmul.f32.gmra.mxu2 %v1496_v54  ;;  %v789_v54 = vld [vmem:[%s1885_s3 + $0x160] sm:$0xff] }
  0x8d   : > { %825 = vmatpush.msra.mxu0 %v748_v39  ;;  %865 = vmatpush.msra.mxu1 %v765_v40 }
  0x8e   : > { %618 = vmatmul.f32.gmra.mxu1 %v1505_v57  ;;  %898 = vmatpush.msra.mxu2 %v789_v54 }
  0x8f   : > { %700 = vmatmul.f32.gmra.mxu3 %v1505_v57  ;;  %826 = vmatpush.msra.mxu0 %v747_v41  ;;  %v1746_v57 = vperm.slane %v1737_v55, 0 }
  0x90   : > { %866 = vmatpush.msra.mxu1 %v764_v42  ;;  %899 = vmatpush.msra.mxu2 %v788_v58 }
  0x91   : > { %827 = vmatpush.msra.mxu0 %v746_v43 }
  0x92   : > { %867 = vmatpush.msra.mxu1 %v763_v44  ;;  %900 = vmatpush.msra.mxu2 %v787_v60  ;;  %v797_v44 = vld [vmem:[%s1885_s3 + $0x1a0] sm:$0xff]  ;;  %v795_v60 = vld [vmem:[%s1885_s3 + $0x190] sm:$0xff] }
  0x93   : > { %828 = vmatpush.msra.mxu0 %v745_v45  ;;  %947 = vmatpush.msra.mxu3 %v797_v44 }
  0x94   : > { %580 = vmatmul.f32.gmra.mxu0 %v1542_v6  ;;  %662 = vmatmul.f32.gmra.mxu2 %v1542_v6  ;;  %v786_v6 = vld [vmem:[%s1885_s3 + $0x148] sm:$0xff] }
  0x95   : > { %868 = vmatpush.msra.mxu1 %v762_v46  ;;  %901 = vmatpush.msra.mxu2 %v786_v6  ;;  %v780_v46 = vld [vmem:[%s1885_s3 + $0x118] sm:$0xff] }
  0x96   : > { %621 = vmatmul.f32.gmra.mxu1 %v1551_v9  ;;  %948 = vmatpush.msra.mxu3 %v796_v48 }
  0x97   : > { %703 = vmatmul.f32.gmra.mxu3 %v1551_v9  ;;  %869 = vmatpush.msra.mxu1 %v761_v49 }
  0x98   : > { %902 = vmatpush.msra.mxu2 %v785_v10  ;;  %949 = vmatpush.msra.mxu3 %v795_v60 }
  0x9a   : > { %903 = vmatpush.msra.mxu2 %v784_v2 }
  0x9c   : > { %583 = vmatmul.f32.gmra.mxu0 %v1570_v16  ;;  %665 = vmatmul.f32.gmra.mxu2 %v1570_v16 }
  0x9d   : > { %904 = vmatpush.msra.mxu2 %v783_v22 }
  0x9e   : > { %624 = vmatmul.f32.gmra.mxu1 %v1573_v17 }
  0x9f   : > { %706 = vmatmul.f32.gmra.mxu3 %v1573_v17  ;;  %905 = vmatpush.msra.mxu2 %v782_v32 }
  0xa1   : > { %906 = vmatpush.msra.mxu2 %v781_v36 }
  0xa3   : > { %907 = vmatpush.msra.mxu2 %v780_v46 }
  0xa4   : > { %586 = vmatmul.f32.gmra.mxu0 %v1580_v18  ;;  %668 = vmatmul.f32.gmra.mxu2 %v1580_v18 }
  0xa5   : > { %908 = vmatpush.msra.mxu2 %v779_v50 }
  0xa6   : > { %627 = vmatmul.f32.gmra.mxu1 %v1583_v19 }
  0xa7   : > { %709 = vmatmul.f32.gmra.mxu3 %v1583_v19 }
  0xa9   : > { %v402_v61 = vpop.f32.mrf.mxu0 }
  0xaa   : > { %v403_v63 = vadd.f32 %v402_v61, %v1746_v57  ;;  %v778_v61 = vld [vmem:[%s1885_s3 + $0x108] sm:$0xff] }
  0xab   : > { %v443_v0 = vpop.f32.mrf.mxu1  ;;  %909 = vmatpush.msra.mxu2 %v778_v61 }
  0xac   : > { %v444_v1 = vadd.f32 %v443_v0, %v403_v63 }
  0xad   : > { %910 = vmatpush.msra.mxu2 %v777_v4 }
  0xae   : > { %v713_v5 = vmax.f32 %v444_v1, 0.0  ;;  %v794_v1 = vld [vmem:[%s1885_s3 + $0x188] sm:$0xff] }
  0xaf   : > { %v484_v7 = vpop.f32.mrf.mxu2  ;;  %950 = vmatpush.msra.mxu3 %v794_v1 }
  0xb0   : > { %v485_v9 = vadd.f32 %v484_v7, %v1760_v3  ;;  %829 = vmatmul.f32.vlgmr.msra.gmra.mxu0 %v713_v5 }
  0xb1   : > { %v405_v11 = vpop.f32.mrf.mxu0 }
  0xb2   : > { %v406_v13 = vadd.f32 %v405_v11, %v1746_v57  ;;  %v525_v14 = vpop.f32.mrf.mxu3 }
  0xb3   : > { %v526_v16 = vadd.f32 %v525_v14, %v485_v9  ;;  %v446_v17 = vpop.f32.mrf.mxu1  ;;  %v793_v14 = vld [vmem:[%s1885_s3 + $0x180] sm:$0xff] }
  0xb4   : > { %v447_v18 = vadd.f32 %v446_v17, %v406_v13  ;;  %951 = vmatpush.msra.mxu3 %v793_v14 }
  0xb5   : > { %v714_v19 = vmax.f32 %v526_v16, 0.0 }
  0xb6   : > { %v717_v62 = vmax.f32 %v447_v18, 0.0 }
  0xb7   : > { %870 = vmatmul.f32.vlgmr.msra.gmra.mxu1 %v714_v19  ;;  %v487_v12 = vpop.f32.mrf.mxu2 }
  0xb8   : > { %v488_v15 = vadd.f32 %v487_v12, %v1760_v3  ;;  %832 = vmatmul.f32.gmra.mxu0 %v717_v62 }
  0xb9   : > { %v408_v23 = vpop.f32.mrf.mxu0 }
  0xba   : > { %v409_v24 = vadd.f32 %v408_v23, %v1746_v57  ;;  %v528_v25 = vpop.f32.mrf.mxu3 }
  0xbb   : > { %v529_v26 = vadd.f32 %v528_v25, %v488_v15  ;;  %v449_v27 = vpop.f32.mrf.mxu1 }
  0xbc   : > { %v450_v28 = vadd.f32 %v449_v27, %v409_v24 }
  0xbd   : > { %v718_v29 = vmax.f32 %v529_v26, 0.0 }
  0xbe   : > { %v721_v31 = vmax.f32 %v450_v28, 0.0 }
  0xbf   : > { %873 = vmatmul.f32.gmra.mxu1 %v718_v29  ;;  %v490_v33 = vpop.f32.mrf.mxu2 }
  0xc0   : > { %v491_v35 = vadd.f32 %v490_v33, %v1760_v3  ;;  %835 = vmatmul.f32.gmra.mxu0 %v721_v31  ;;  %v1840_v33 = vperm.slane %v1737_v55, 2 }
  0xc1   : > { %v411_v37 = vpop.f32.mrf.mxu0 }
  0xc2   : > { %v412_v38 = vadd.f32 %v411_v37, %v1746_v57  ;;  %v531_v39 = vpop.f32.mrf.mxu3 }
  0xc3   : > { %v532_v40 = vadd.f32 %v531_v39, %v491_v35  ;;  %v452_v41 = vpop.f32.mrf.mxu1 }
  0xc4   : > { %v453_v42 = vadd.f32 %v452_v41, %v412_v38  ;;  %v1845_v41 = vperm.slane %v1737_v55, 3 }
  0xc5   : > { %v722_v43 = vmax.f32 %v532_v40, 0.0 }
  0xc6   : > { %v725_v45 = vmax.f32 %v453_v42, 0.0 }
  0xc7   : > { %876 = vmatmul.f32.gmra.mxu1 %v722_v43  ;;  %v493_v47 = vpop.f32.mrf.mxu2 }
  0xc8   : > { %v494_v49 = vadd.f32 %v493_v47, %v1760_v3  ;;  %838 = vmatmul.f32.gmra.mxu0 %v725_v45 }
  0xc9   : > { %v414_v51 = vpop.f32.mrf.mxu0 }
  0xca   : > { %v415_v52 = vadd.f32 %v414_v51, %v1746_v57  ;;  %v534_v53 = vpop.f32.mrf.mxu3 }
  0xcb   : > { %v535_v54 = vadd.f32 %v534_v53, %v494_v49  ;;  %v455_v56 = vpop.f32.mrf.mxu1 }
  0xcc   : > { %v456_v58 = vadd.f32 %v455_v56, %v415_v52 }
  0xcd   : > { %v726_v59 = vmax.f32 %v535_v54, 0.0 }
  0xce   : > { %v729_v63 = vmax.f32 %v456_v58, 0.0 }
  0xcf   : > { %879 = vmatmul.f32.gmra.mxu1 %v726_v59  ;;  %v496_v0 = vpop.f32.mrf.mxu2 }
  0xd0   : > { %v497_v5 = vadd.f32 %v496_v0, %v1760_v3  ;;  %841 = vmatmul.f32.gmra.mxu0 %v729_v63 }
  0xd1   : > { %v417_v6 = vpop.f32.mrf.mxu0 }
  0xd2   : > { %v418_v7 = vadd.f32 %v417_v6, %v1746_v57  ;;  %v537_v8 = vpop.f32.mrf.mxu3 }
  0xd3   : > { %v538_v9 = vadd.f32 %v537_v8, %v497_v5  ;;  %v458_v10 = vpop.f32.mrf.mxu1 }
  0xd4   : > { %v459_v11 = vadd.f32 %v458_v10, %v418_v7 }
  0xd5   : > { %v730_v13 = vmax.f32 %v538_v9, 0.0 }
  0xd6   : > { %v733_v16 = vmax.f32 %v459_v11, 0.0 }
  0xd7   : > { %882 = vmatmul.f32.gmra.mxu1 %v730_v13  ;;  %v499_v17 = vpop.f32.mrf.mxu2 }
  0xd8   : > { %v500_v18 = vadd.f32 %v499_v17, %v1760_v3  ;;  %844 = vmatmul.f32.gmra.mxu0 %v733_v16 }
  0xd9   : > { %v420_v19 = vpop.f32.mrf.mxu0 }
  0xda   : > { %v421_v20 = vadd.f32 %v420_v19, %v1746_v57  ;;  %v540_v62 = vpop.f32.mrf.mxu3 }
  0xdb   : > { %v541_v2 = vadd.f32 %v540_v62, %v500_v18  ;;  %v461_v12 = vpop.f32.mrf.mxu1 }
  0xdc   : > { %v462_v21 = vadd.f32 %v461_v12, %v421_v20 }
  0xdd   : > { %v734_v15 = vmax.f32 %v541_v2, 0.0 }
  0xde   : > { %v737_v22 = vmax.f32 %v462_v21, 0.0 }
  0xdf   : > { %885 = vmatmul.f32.gmra.mxu1 %v734_v15  ;;  %v502_v23 = vpop.f32.mrf.mxu2 }
  0xe0   : > { %v503_v24 = vadd.f32 %v502_v23, %v1760_v3  ;;  %847 = vmatmul.f32.gmra.mxu0 %v737_v22 }
  0xe1   : > { %v423_v25 = vpop.f32.mrf.mxu0 }
  0xe2   : > { %v424_v26 = vadd.f32 %v423_v25, %v1746_v57  ;;  %v543_v27 = vpop.f32.mrf.mxu3 }
  0xe3   : > { %v544_v28 = vadd.f32 %v543_v27, %v503_v24  ;;  %v464_v29 = vpop.f32.mrf.mxu1 }
  0xe4   : > { %v465_v30 = vadd.f32 %v464_v29, %v424_v26 }
  0xe5   : > { %v738_v31 = vmax.f32 %v544_v28, 0.0 }
  0xe6   : > { %v741_v32 = vmax.f32 %v465_v30, 0.0 }
  0xe7   : > { %888 = vmatmul.f32.gmra.mxu1 %v738_v31  ;;  %v505_v34 = vpop.f32.mrf.mxu2 }
  0xe8   : > { %v506_v35 = vadd.f32 %v505_v34, %v1760_v3  ;;  %850 = vmatmul.f32.gmra.mxu0 %v741_v32 }
  0xe9   : > { %v566_v36 = vpop.f32.mrf.mxu0 }
  0xea   : > { %v546_v37 = vpop.f32.mrf.mxu3  ;;  %v567_v38 = vadd.f32 %v566_v36, %v1840_v33 }
  0xeb   : > { %v547_v39 = vadd.f32 %v546_v37, %v506_v35  ;;  %v607_v57 = vpop.f32.mrf.mxu1 }
  0xec   : > { %v608_v40 = vadd.f32 %v607_v57, %v567_v38 }
  0xed   : > { %v742_v42 = vmax.f32 %v547_v39, 0.0 }
  0xee   : > { %v715_v43 = vmax.f32 %v608_v40, 0.0 }
  0xef   : > { %891 = vmatmul.f32.gmra.mxu1 %v742_v42  ;;  %v648_v44 = vpop.f32.mrf.mxu2 }
  0xf0   : > { %v649_v45 = vadd.f32 %v648_v44, %v1845_v41  ;;  %911 = vmatmul.f32.vlgmr.msra.gmra.mxu2 %v715_v43 }
  0xf1   : > { %v569_v46 = vpop.f32.mrf.mxu0 }
  0xf2   : > { %v570_v3 = vadd.f32 %v569_v46, %v1840_v33  ;;  %v689_v47 = vpop.f32.mrf.mxu3 }
  0xf3   : > { %v690_v48 = vadd.f32 %v689_v47, %v649_v45  ;;  %v610_v49 = vpop.f32.mrf.mxu1 }
  0xf4   : > { %v611_v50 = vadd.f32 %v610_v49, %v570_v3 }
  0xf5   : > { %v716_v51 = vmax.f32 %v690_v48, 0.0 }
  0xf6   : > { %v719_v52 = vmax.f32 %v611_v50, 0.0 }
  0xf7   : > { %952 = vmatmul.f32.vlgmr.msra.gmra.mxu3 %v716_v51  ;;  %v651_v53 = vpop.f32.mrf.mxu2 }
  0xf8   : > { %v652_v55 = vadd.f32 %v651_v53, %v1845_v41  ;;  %914 = vmatmul.f32.gmra.mxu2 %v719_v52 }
  0xf9   : > { %v572_v54 = vpop.f32.mrf.mxu0 }
  0xfa   : > { %v573_v56 = vadd.f32 %v572_v54, %v1840_v33  ;;  %v692_v58 = vpop.f32.mrf.mxu3 }
  0xfb   : > { %v693_v59 = vadd.f32 %v692_v58, %v652_v55  ;;  %v613_v60 = vpop.f32.mrf.mxu1 }
  0xfc   : > { %v614_v61 = vadd.f32 %v613_v60, %v573_v56 }
  0xfd   : > { %v720_v63 = vmax.f32 %v693_v59, 0.0 }
  0xfe   : > { %v723_v0 = vmax.f32 %v614_v61, 0.0 }
  0xff   : > { %955 = vmatmul.f32.gmra.mxu3 %v720_v63  ;;  %v654_v1 = vpop.f32.mrf.mxu2 }
 0x100   : > { %v655_v4 = vadd.f32 %v654_v1, %v1845_v41  ;;  %917 = vmatmul.f32.gmra.mxu2 %v723_v0 }
 0x101   : > { %v575_v5 = vpop.f32.mrf.mxu0 }
 0x102   : > { %v576_v6 = vadd.f32 %v575_v5, %v1840_v33  ;;  %v695_v7 = vpop.f32.mrf.mxu3 }
 0x103   : > { %v696_v8 = vadd.f32 %v695_v7, %v655_v4  ;;  %v616_v9 = vpop.f32.mrf.mxu1 }
 0x104   : > { %v617_v10 = vadd.f32 %v616_v9, %v576_v6 }
 0x105   : > { %v724_v11 = vmax.f32 %v696_v8, 0.0 }
 0x106   : > { %v727_v13 = vmax.f32 %v617_v10, 0.0 }
 0x107   : > { %958 = vmatmul.f32.gmra.mxu3 %v724_v11  ;;  %v657_v14 = vpop.f32.mrf.mxu2 }
 0x108   : > { %v658_v16 = vadd.f32 %v657_v14, %v1845_v41  ;;  %920 = vmatmul.f32.gmra.mxu2 %v727_v13 }
 0x109   : > { %v578_v17 = vpop.f32.mrf.mxu0 }
 0x10a   : > { %v579_v18 = vadd.f32 %v578_v17, %v1840_v33  ;;  %v698_v19 = vpop.f32.mrf.mxu3 }
 0x10b   : > { %v699_v20 = vadd.f32 %v698_v19, %v658_v16  ;;  %v619_v62 = vpop.f32.mrf.mxu1 }
 0x10c   : > { %v620_v2 = vadd.f32 %v619_v62, %v579_v18 }
 0x10d   : > { %v728_v12 = vmax.f32 %v699_v20, 0.0 }
 0x10e   : > { %v731_v21 = vmax.f32 %v620_v2, 0.0 }
 0x10f   : > { %961 = vmatmul.f32.gmra.mxu3 %v728_v12  ;;  %v660_v15 = vpop.f32.mrf.mxu2 }
 0x110   : > { %v661_v22 = vadd.f32 %v660_v15, %v1845_v41  ;;  %923 = vmatmul.f32.gmra.mxu2 %v731_v21 }
 0x111   : > { %v581_v23 = vpop.f32.mrf.mxu0 }
 0x112   : > { %v582_v24 = vadd.f32 %v581_v23, %v1840_v33  ;;  %v701_v25 = vpop.f32.mrf.mxu3 }
 0x113   : > { %v702_v26 = vadd.f32 %v701_v25, %v661_v22  ;;  %v622_v27 = vpop.f32.mrf.mxu1 }
 0x114   : > { %v623_v28 = vadd.f32 %v622_v27, %v582_v24 }
 0x115   : > { %v732_v29 = vmax.f32 %v702_v26, 0.0 }
 0x116   : > { %v735_v30 = vmax.f32 %v623_v28, 0.0 }
 0x117   : > { %964 = vmatmul.f32.gmra.mxu3 %v732_v29  ;;  %v663_v31 = vpop.f32.mrf.mxu2 }
 0x118   : > { %v664_v32 = vadd.f32 %v663_v31, %v1845_v41  ;;  %926 = vmatmul.f32.gmra.mxu2 %v735_v30 }
 0x119   : > { %v584_v34 = vpop.f32.mrf.mxu0 }
 0x11a   : > { %v585_v35 = vadd.f32 %v584_v34, %v1840_v33  ;;  %v704_v36 = vpop.f32.mrf.mxu3 }
 0x11b   : > { %v705_v37 = vadd.f32 %v704_v36, %v664_v32  ;;  %v625_v38 = vpop.f32.mrf.mxu1 }
 0x11c   : > { %v626_v39 = vadd.f32 %v625_v38, %v585_v35 }
 0x11d   : > { %v736_v57 = vmax.f32 %v705_v37, 0.0 }
 0x11e   : > { %v739_v40 = vmax.f32 %v626_v39, 0.0 }
 0x11f   : > { %967 = vmatmul.f32.gmra.mxu3 %v736_v57  ;;  %v666_v42 = vpop.f32.mrf.mxu2 }
 0x120   : > { %v667_v43 = vadd.f32 %v666_v42, %v1845_v41  ;;  %929 = vmatmul.f32.gmra.mxu2 %v739_v40 }
 0x121   : > { %v587_v44 = vpop.f32.mrf.mxu0 }
 0x122   : > { %v588_v45 = vadd.f32 %v587_v44, %v1840_v33  ;;  %v707_v46 = vpop.f32.mrf.mxu3  ;;  %v1062_v33 = vld [vmem:[%s1886_s4] ss:$0 sm:$0xff] }
 0x123   : > { %v708_v3 = vadd.f32 %v707_v46, %v667_v43  ;;  %v628_v47 = vpop.f32.mrf.mxu1 }
 0x124   : > { %v629_v48 = vadd.f32 %v628_v47, %v588_v45 }
 0x125   : > { %v740_v49 = vmax.f32 %v708_v3, 0.0 }
 0x126   : > { %v743_v50 = vmax.f32 %v629_v48, 0.0 }
 0x127   : > { %970 = vmatmul.f32.gmra.mxu3 %v740_v49  ;;  %v669_v51 = vpop.f32.mrf.mxu2 }
 0x128   : > { %v670_v52 = vadd.f32 %v669_v51, %v1845_v41  ;;  %932 = vmatmul.f32.gmra.mxu2 %v743_v50 }
 0x12a   : > { %v710_v53 = vpop.f32.mrf.mxu3 }
 0x12b   : > { %v711_v55 = vadd.f32 %v710_v53, %v670_v52 }
 0x12d   : > { %v744_v54 = vmax.f32 %v711_v55, 0.0  ;;  %v830_v56 = vpop.f32.mrf.mxu0 }
 0x12e   : > { %v831_v61 = vadd.f32 %v1062_v33, %v830_v56 }
 0x12f   : > { %973 = vmatmul.f32.gmra.mxu3 %v744_v54 }
 0x134   : > { %v871_v58 = vpop.f32.mrf.mxu1 }
 0x135   : > { %v833_v59 = vpop.f32.mrf.mxu0  ;;  %v872_v1 = vadd.f32 %v871_v58, %v831_v61 }
 0x136   : > { %v834_v6 = vadd.f32 %v1062_v33, %v833_v59 }
 0x13c   : > { %v874_v60 = vpop.f32.mrf.mxu1 }
 0x13d   : > { %v836_v0 = vpop.f32.mrf.mxu0  ;;  %v875_v9 = vadd.f32 %v874_v60, %v834_v6 }
 0x13e   : > { %v837_v14 = vadd.f32 %v1062_v33, %v836_v0 }
 0x144   : > { %v877_v41 = vpop.f32.mrf.mxu1 }
 0x145   : > { %v839_v10 = vpop.f32.mrf.mxu0  ;;  %v878_v19 = vadd.f32 %v877_v41, %v837_v14 }
 0x146   : > { %v840_v12 = vadd.f32 %v1062_v33, %v839_v10 }
 0x14c   : > { %v880_v18 = vpop.f32.mrf.mxu1 }
 0x14d   : > { %v842_v62 = vpop.f32.mrf.mxu0  ;;  %v881_v23 = vadd.f32 %v880_v18, %v840_v12 }
 0x14e   : > { %v843_v26 = vadd.f32 %v1062_v33, %v842_v62 }
 0x154   : > { %v883_v22 = vpop.f32.mrf.mxu1 }
 0x155   : > { %v845_v29 = vpop.f32.mrf.mxu0  ;;  %v884_v30 = vadd.f32 %v883_v22, %v843_v26 }
 0x156   : > { %v846_v35 = vadd.f32 %v1062_v33, %v845_v29 }
 0x15c   : > { %v886_v31 = vpop.f32.mrf.mxu1 }
 0x15d   : > { %v848_v38 = vpop.f32.mrf.mxu0  ;;  %v887_v39 = vadd.f32 %v886_v31, %v846_v35 }
 0x15e   : > { %v849_v43 = vadd.f32 %v1062_v33, %v848_v38 }
 0x164   : > { %v889_v40 = vpop.f32.mrf.mxu1 }
 0x165   : > { %v890_v46 = vadd.f32 %v889_v40, %v849_v43  ;;  %v851_v3 = vpop.f32.mrf.mxu0 }
 0x166   : > { %v852_v49 = vadd.f32 %v1062_v33, %v851_v3 }
 0x16c   : > { %v892_v51 = vpop.f32.mrf.mxu1 }
 0x16d   : > { %v893_v53 = vadd.f32 %v892_v51, %v852_v49 }
 0x173   : > { %v912_v63 = vpop.f32.mrf.mxu2 }
 0x174   : > { %v913_v4 = vadd.f32 %v912_v63, %v872_v1 }
 0x17a   : > { %v953_v5 = vpop.f32.mrf.mxu3 }
 0x17b   : > { %v954_v7 = vadd.f32 %v953_v5, %v913_v4  ;;  %v915_v8 = vpop.f32.mrf.mxu2 }
 0x17c   : > { %v916_v11 = vadd.f32 %v915_v8, %v875_v9 }
 0x17d   : > { %977 = vst [vmem:[%s1869_s30] sm:$0xff] %v954_v7 }
 0x182   : > { %v956_v13 = vpop.f32.mrf.mxu3 }
 0x183   : > { %v957_v16 = vadd.f32 %v956_v13, %v916_v11  ;;  %v918_v17 = vpop.f32.mrf.mxu2 }
 0x184   : > { %v919_v20 = vadd.f32 %v918_v17, %v878_v19 }
 0x185   : > { %978 = vst [vmem:[%s1869_s30 + $0x8] sm:$0xff] %v957_v16 }
 0x18a   : > { %v959_v2 = vpop.f32.mrf.mxu3 }
 0x18b   : > { %v960_v21 = vadd.f32 %v959_v2, %v919_v20  ;;  %v921_v15 = vpop.f32.mrf.mxu2 }
 0x18c   : > { %v922_v24 = vadd.f32 %v921_v15, %v881_v23 }
 0x18d   : > { %979 = vst [vmem:[%s1869_s30 + $0x10] sm:$0xff] %v960_v21 }
 0x192   : > { %v962_v25 = vpop.f32.mrf.mxu3 }
 0x193   : > { %v963_v27 = vadd.f32 %v962_v25, %v922_v24  ;;  %v924_v28 = vpop.f32.mrf.mxu2 }
 0x194   : > { %v925_v32 = vadd.f32 %v924_v28, %v884_v30 }
 0x195   : > { %980 = vst [vmem:[%s1869_s30 + $0x18] sm:$0xff] %v963_v27 }
 0x19a   : > { %v965_v34 = vpop.f32.mrf.mxu3 }
 0x19b   : > { %v966_v36 = vadd.f32 %v965_v34, %v925_v32  ;;  %v927_v37 = vpop.f32.mrf.mxu2 }
 0x19c   : > { %v928_v57 = vadd.f32 %v927_v37, %v887_v39 }
 0x19d   : > { %981 = vst [vmem:[%s1869_s30 + $0x20] sm:$0xff] %v966_v36 }
 0x1a2   : > { %v968_v42 = vpop.f32.mrf.mxu3 }
 0x1a3   : > { %v969_v44 = vadd.f32 %v968_v42, %v928_v57  ;;  %v930_v45 = vpop.f32.mrf.mxu2 }
 0x1a4   : > { %v931_v47 = vadd.f32 %v930_v45, %v890_v46 }
 0x1a5   : > { %982 = vst [vmem:[%s1869_s30 + $0x28] sm:$0xff] %v969_v44 }
 0x1aa   : > { %v971_v48 = vpop.f32.mrf.mxu3 }
 0x1ab   : > { %v972_v50 = vadd.f32 %v971_v48, %v931_v47  ;;  %v933_v52 = vpop.f32.mrf.mxu2 }
 0x1ac   : > { %v934_v55 = vadd.f32 %v933_v52, %v893_v53 }
 0x1ad   : > { %983 = vst [vmem:[%s1869_s30 + $0x30] sm:$0xff] %v972_v50 }
 0x1b2   : > { %v974_v54 = vpop.f32.mrf.mxu3 }
 0x1b3   : > { %v975_v56 = vadd.f32 %v974_v54, %v934_v55 }
 0x1b5   : > { %984 = vst [vmem:[%s1869_s30 + $0x38] sm:$0xff] %v975_v56 }
 0x1b6 PF: > { %s15_s18 = sadd.s32 1, %s1069_s18  }
 0x1b7   : > { %p12_p4 = scmp.ge.s32.totalorder %s15_s18, 4  }
 0x1b9   :  { %14 = sbr.rel (!%p12_p4) target bundleno = 1 (0x1), region = 70 }

</bundles_post_ra>
